<compile_context>
chip_gen: v5e
topology: v5e:2x2
jax: 0.10.0
libtpu: 0.0.40
codegen_flags: <defaults>
</compile_context>

<pallas_src>
import jax
import jax.numpy as jnp
from jax import lax
from jax.experimental import pallas as pl
from jax.experimental.pallas import tpu as pltpu

IN_F, HID, OUT_F = 2, 20, 1
LANE = 128      # TPU lane width: the batch axis maps to lanes
CHUNK = 512     # lanes per inner vreg-resident chunk


def mlp_kernel(x_ref, w1_ref, b1_ref, w2_ref, b2_ref, w3c_ref, b3_ref, o_ref):
    """Fused 3-layer MLP on one lane-dense batch tile (batch on lanes).

    x tile is (IN_F, T); output tile is (OUT_F, T).  Intermediates are kept
    vreg-resident by iterating over CHUNK-lane slices of the tile.
    """
    # Tiny weights/biases: load once per grid step, outside the chunk loop.
    w1 = w1_ref[...]        # (HID, IN_F)  = (20, 2)
    b1 = b1_ref[...]        # (HID, 1)
    w2 = w2_ref[...]        # (HID, HID)   = (20, 20)
    b2 = b2_ref[...]        # (HID, 1)
    w3c = w3c_ref[...]      # (HID, OUT_F) = (20, 1)  (layer-3 weight, pre-transposed)
    b3 = b3_ref[...]        # (OUT_F, 1)

    # Layer-1 columns: K=2, so two broadcast FMAs on the VPU beat an MXU pass.
    w1a = w1[:, 0:1]        # (HID, 1)
    w1b = w1[:, 1:2]        # (HID, 1)

    tile = x_ref.shape[1]
    chunk = min(CHUNK, tile)
    n_chunks = tile // chunk            # wrapper guarantees tile % chunk == 0

    def layers(x):                      # x: (IN_F, C)
        # Layer 1 (K=2): VPU broadcast FMAs, skip the MXU.
        h1 = jnp.maximum(w1a * x[0:1, :] + w1b * x[1:2, :] + b1, 0.0)   # (20, C)
        # Layer 2 (20x20): MXU.
        h2 = jnp.dot(w2, h1, preferred_element_type=jnp.float32) + b2
        h2 = jnp.maximum(h2, 0.0)                                       # (20, C)
        # Layer 3 (M=1): VPU multiply + sublane reduction, skip the MXU.
        return jnp.sum(w3c * h2, axis=0, keepdims=True) + b3            # (1, C)

    if n_chunks == 1:
        o_ref[...] = layers(x_ref[...]).astype(o_ref.dtype)
    else:
        def body(c, carry):
            off = pl.multiple_of(c * chunk, LANE)
            y = layers(x_ref[:, pl.ds(off, chunk)])
            o_ref[:, pl.ds(off, chunk)] = y.astype(o_ref.dtype)
            return carry
        lax.fori_loop(0, n_chunks, body, 0, unroll=(n_chunks <= 8))


def simple_kernel_forward(x, params, *, batch_tile=65536):
    """x: [N, 2] float32 -> [N, 1] float32 (same semantics as the torch module)."""
    w1, b1, w2, b2, w3, b3 = params     # PyTorch-native [out, in] weights, [out, 1] biases
    n = x.shape[0]

    # --- Pick the batch tile (lanes per grid step). ---
    n_lane = pl.cdiv(n, LANE) * LANE
    tile = min(batch_tile, n_lane)
    if tile >= CHUNK:
        tile = (tile // CHUNK) * CHUNK  # inner chunk loop divides the tile evenly
        granule = CHUNK
    else:
        granule = LANE                  # single chunk == whole tile (128-multiple)
    # Keep >= 4 grid steps on big batches so both v7x TensorCores get >= 2 steps
    # on the "parallel" axis; no-op for small batches and harmless on v5e/v6e.
    min_steps = 4
    if n_lane >= min_steps * 8 * granule:
        cap = (n_lane // min_steps // granule) * granule
        tile = max(granule, min(tile, cap))
    n_pad = pl.cdiv(n, tile) * tile
    grid = (n_pad // tile,)

    # Batch-on-lanes: [IN_F, n_pad].  jnp.pad over x.T lets XLA fuse the
    # transpose + tail-pad without a full zero-init/copy pass.
    x_t = jnp.pad(x.astype(jnp.float32).T, ((0, 0), (0, n_pad - n)))

    # Pre-transpose the tiny layer-3 weight so the kernel does a sublane reduce.
    w3c = w3.T                          # (HID, OUT_F)

    def whole(shape):
        # Tiny weights/biases: full-array block, same block every grid step.
        return pl.BlockSpec(shape, lambda i: tuple(0 for _ in shape))

    out_t = pl.pallas_call(
        mlp_kernel,
        out_shape=jax.ShapeDtypeStruct((OUT_F, n_pad), jnp.float32),
        grid_spec=pltpu.PrefetchScalarGridSpec(
            num_scalar_prefetch=0,
            grid=grid,
            in_specs=[
                pl.BlockSpec((IN_F, tile), lambda i: (0, i)),  # x tile (lanes = batch)
                whole((HID, IN_F)),     # w1
                whole((HID, 1)),        # b1
                whole((HID, HID)),      # w2
                whole((HID, 1)),        # b2
                whole((HID, OUT_F)),    # w3 (transposed)
                whole((OUT_F, 1)),      # b3
            ],
            out_specs=pl.BlockSpec((OUT_F, tile), lambda i: (0, i)),
        ),
        compiler_params=pltpu.CompilerParams(
            dimension_semantics=("parallel",),
        ),
    )(x_t, w1, b1, w2, b2, w3c, b3)

    # Drop padding, return row-major [N, 1] like torch.
    return out_t[:, :n].T


def init_params(key):
    """Deterministic parameter init in PyTorch-native [out, in] / [out, 1] layout."""
    k1, k2, k3, k4, k5, k6 = jax.random.split(key, 6)
    w1 = jax.random.normal(k1, (HID, IN_F), jnp.float32) * 0.1
    b1 = jax.random.normal(k2, (HID, 1), jnp.float32) * 0.1
    w2 = jax.random.normal(k3, (HID, HID), jnp.float32) * 0.1
    b2 = jax.random.normal(k4, (HID, 1), jnp.float32) * 0.1
    w3 = jax.random.normal(k5, (OUT_F, HID), jnp.float32) * 0.1
    b3 = jax.random.normal(k6, (OUT_F, 1), jnp.float32) * 0.1
    return (w1, b1, w2, b2, w3, b3)


def mlp_ref(x, params):
    """Pure-JAX reference (nn.Linear semantics: y = x @ W.T + b)."""
    w1, b1, w2, b2, w3, b3 = params
    h = jnp.maximum(x @ w1.T + b1.T, 0.0)
    h = jnp.maximum(h @ w2.T + b2.T, 0.0)
    return h @ w3.T + b3.T


if __name__ == "__main__":
    key = jax.random.PRNGKey(0)
    pkey, k_small, k_big = jax.random.split(key, 3)
    params = init_params(pkey)

    # Small, non-multiple of 128: exercises tail padding (grid=1, single chunk).
    x_small = jax.random.normal(k_small, (16, IN_F), jnp.float32)
    out_small = jax.block_until_ready(simple_kernel_forward(x_small, params))
    assert out_small.shape == (16, OUT_F)
    assert jnp.allclose(out_small, mlp_ref(x_small, params), atol=1e-5, rtol=1e-5)

    # Larger batch: exercises the inner vreg-resident lane-chunk loop (4 chunks).
    x_big = jax.random.normal(k_big, (2000, IN_F), jnp.float32)
    out_big = jax.block_until_ready(simple_kernel_forward(x_big, params))
    assert out_big.shape == (2000, OUT_F)
    assert jnp.allclose(out_big, mlp_ref(x_big, params), atol=1e-5, rtol=1e-5)

    print("KERNEL_OK")
</pallas_src>

<mosaic_0001>
module attributes {stable_mosaic.version = 11 : i64} {
  func.func @mlp_kernel(%arg0: i32, %arg1: memref<2x128xf32, #tpu.memory_space<vmem>>, %arg2: memref<20x2xf32, #tpu.memory_space<vmem>>, %arg3: memref<20x1xf32, #tpu.memory_space<vmem>>, %arg4: memref<20x20xf32, #tpu.memory_space<vmem>>, %arg5: memref<20x1xf32, #tpu.memory_space<vmem>>, %arg6: memref<20x1xf32, #tpu.memory_space<vmem>>, %arg7: memref<1x1xf32, #tpu.memory_space<vmem>>, %arg8: memref<1x128xf32, #tpu.memory_space<vmem>>) attributes {dimension_semantics = [#tpu.dimension_semantics<parallel>], iteration_bounds = array<i64: 1>, scalar_prefetch = 0 : i64, scratch_operands = 0 : i64, tpu.core_type = #tpu.core_type<tc>, window_params = [{transform_indices = @transform_0, window_bounds = array<i64: 2, 128>}, {pipeline_mode = #tpu.pipeline_mode<synchronous>, transform_indices = @transform_1, window_bounds = array<i64: 20, 2>}, {pipeline_mode = #tpu.pipeline_mode<synchronous>, transform_indices = @transform_2, window_bounds = array<i64: 20, 1>}, {pipeline_mode = #tpu.pipeline_mode<synchronous>, transform_indices = @transform_3, window_bounds = array<i64: 20, 20>}, {pipeline_mode = #tpu.pipeline_mode<synchronous>, transform_indices = @transform_4, window_bounds = array<i64: 20, 1>}, {pipeline_mode = #tpu.pipeline_mode<synchronous>, transform_indices = @transform_5, window_bounds = array<i64: 20, 1>}, {pipeline_mode = #tpu.pipeline_mode<synchronous>, transform_indices = @transform_6, window_bounds = array<i64: 1, 1>}, {transform_indices = @transform_7, window_bounds = array<i64: 1, 128>}]} {
    %c0 = arith.constant 0 : index
    %c0_0 = arith.constant 0 : index
    %0 = vector.load %arg2[%c0, %c0_0] : memref<20x2xf32, #tpu.memory_space<vmem>>, vector<20x2xf32>
    %c0_1 = arith.constant 0 : index
    %c0_2 = arith.constant 0 : index
    %1 = vector.load %arg3[%c0_1, %c0_2] : memref<20x1xf32, #tpu.memory_space<vmem>>, vector<20x1xf32>
    %c0_3 = arith.constant 0 : index
    %c0_4 = arith.constant 0 : index
    %2 = vector.load %arg4[%c0_3, %c0_4] : memref<20x20xf32, #tpu.memory_space<vmem>>, vector<20x20xf32>
    %c0_5 = arith.constant 0 : index
    %c0_6 = arith.constant 0 : index
    %3 = vector.load %arg5[%c0_5, %c0_6] : memref<20x1xf32, #tpu.memory_space<vmem>>, vector<20x1xf32>
    %c0_7 = arith.constant 0 : index
    %c0_8 = arith.constant 0 : index
    %4 = vector.load %arg6[%c0_7, %c0_8] : memref<20x1xf32, #tpu.memory_space<vmem>>, vector<20x1xf32>
    %c0_9 = arith.constant 0 : index
    %c0_10 = arith.constant 0 : index
    %5 = vector.load %arg7[%c0_9, %c0_10] : memref<1x1xf32, #tpu.memory_space<vmem>>, vector<1x1xf32>
    %6 = vector.extract_strided_slice %0 {offsets = [0, 0], sizes = [20, 1], strides = [1, 1]} : vector<20x2xf32> to vector<20x1xf32>
    %7 = vector.extract_strided_slice %0 {offsets = [0, 1], sizes = [20, 1], strides = [1, 1]} : vector<20x2xf32> to vector<20x1xf32>
    %c0_11 = arith.constant 0 : index
    %c0_12 = arith.constant 0 : index
    %8 = vector.load %arg1[%c0_11, %c0_12] : memref<2x128xf32, #tpu.memory_space<vmem>>, vector<2x128xf32>
    %9 = vector.extract_strided_slice %8 {offsets = [0, 0], sizes = [1, 128], strides = [1, 1]} : vector<2x128xf32> to vector<1x128xf32>
    %10 = vector.broadcast %6 : vector<20x1xf32> to vector<20x128xf32>
    %11 = vector.broadcast %9 : vector<1x128xf32> to vector<20x128xf32>
    %12 = arith.mulf %10, %11 : vector<20x128xf32>
    %13 = vector.extract_strided_slice %8 {offsets = [1, 0], sizes = [1, 128], strides = [1, 1]} : vector<2x128xf32> to vector<1x128xf32>
    %14 = vector.broadcast %7 : vector<20x1xf32> to vector<20x128xf32>
    %15 = vector.broadcast %13 : vector<1x128xf32> to vector<20x128xf32>
    %16 = arith.mulf %14, %15 : vector<20x128xf32>
    %17 = arith.addf %12, %16 : vector<20x128xf32>
    %18 = vector.broadcast %1 : vector<20x1xf32> to vector<20x128xf32>
    %19 = arith.addf %17, %18 : vector<20x128xf32>
    %cst = arith.constant 0.000000e+00 : f32
    %20 = vector.broadcast %cst : f32 to vector<20x128xf32>
    %21 = arith.maximumf %19, %20 : vector<20x128xf32>
    %cst_13 = arith.constant dense<0.000000e+00> : vector<20x128xf32>
    %22 = tpu.matmul %2, %21, %cst_13 {dimension_numbers = #tpu.dot_dimension_numbers<[1], [0], [0], [1], [0, 0, 1, 1], [], []>} : vector<20x20xf32>, vector<20x128xf32>, vector<20x128xf32> -> vector<20x128xf32>
    %23 = vector.broadcast %3 : vector<20x1xf32> to vector<20x128xf32>
    %24 = arith.addf %22, %23 : vector<20x128xf32>
    %cst_14 = arith.constant 0.000000e+00 : f32
    %25 = vector.broadcast %cst_14 : f32 to vector<20x128xf32>
    %26 = arith.maximumf %24, %25 : vector<20x128xf32>
    %27 = vector.broadcast %4 : vector<20x1xf32> to vector<20x128xf32>
    %28 = arith.mulf %27, %26 : vector<20x128xf32>
    %cst_15 = arith.constant dense<0.000000e+00> : vector<128xf32>
    %29 = vector.multi_reduction <add>, %28, %cst_15 [0] : vector<20x128xf32> to vector<128xf32>
    %30 = vector.shape_cast %29 : vector<128xf32> to vector<1x128xf32>
    %31 = vector.broadcast %5 : vector<1x1xf32> to vector<1x128xf32>
    %32 = arith.addf %30, %31 : vector<1x128xf32>
    %c0_16 = arith.constant 0 : index
    %c0_17 = arith.constant 0 : index
    %33 = vector.load %arg8[%c0_16, %c0_17] : memref<1x128xf32, #tpu.memory_space<vmem>>, vector<1x128xf32>
    tpu.vector_store %arg8[%c0_16, %c0_17], %32 {strides = array<i32>} : memref<1x128xf32, #tpu.memory_space<vmem>>, vector<1x128xf32>,
    return
  }
  func.func @transform_0(%arg0: i32) -> (i32, i32) {
    %c0_i32 = arith.constant 0 : i32
    %c0_i32_0 = arith.constant 0 : i32
    return %c0_i32, %arg0 : i32, i32
  }
  func.func @transform_1(%arg0: i32) -> (i32, i32) {
    %c0_i32 = arith.constant 0 : i32
    %c0_i32_0 = arith.constant 0 : i32
    %c0_i32_1 = arith.constant 0 : i32
    return %c0_i32, %c0_i32_0 : i32, i32
  }
  func.func @transform_2(%arg0: i32) -> (i32, i32) {
    %c0_i32 = arith.constant 0 : i32
    %c0_i32_0 = arith.constant 0 : i32
    %c0_i32_1 = arith.constant 0 : i32
    return %c0_i32, %c0_i32_0 : i32, i32
  }
  func.func @transform_3(%arg0: i32) -> (i32, i32) {
    %c0_i32 = arith.constant 0 : i32
    %c0_i32_0 = arith.constant 0 : i32
    %c0_i32_1 = arith.constant 0 : i32
    return %c0_i32, %c0_i32_0 : i32, i32
  }
  func.func @transform_4(%arg0: i32) -> (i32, i32) {
    %c0_i32 = arith.constant 0 : i32
    %c0_i32_0 = arith.constant 0 : i32
    %c0_i32_1 = arith.constant 0 : i32
    return %c0_i32, %c0_i32_0 : i32, i32
  }
  func.func @transform_5(%arg0: i32) -> (i32, i32) {
    %c0_i32 = arith.constant 0 : i32
    %c0_i32_0 = arith.constant 0 : i32
    %c0_i32_1 = arith.constant 0 : i32
    return %c0_i32, %c0_i32_0 : i32, i32
  }
  func.func @transform_6(%arg0: i32) -> (i32, i32) {
    %c0_i32 = arith.constant 0 : i32
    %c0_i32_0 = arith.constant 0 : i32
    %c0_i32_1 = arith.constant 0 : i32
    return %c0_i32, %c0_i32_0 : i32, i32
  }
  func.func @transform_7(%arg0: i32) -> (i32, i32) {
    %c0_i32 = arith.constant 0 : i32
    %c0_i32_0 = arith.constant 0 : i32
    return %c0_i32, %arg0 : i32, i32
  }
}

</mosaic_0001>

<bundles_post_ra>
// kernel: tpu_custom_call.1
= control target key start
LH: loop header
LB: loop body
LE: loop exit
PB: predicated region body
PF: predicated region fallthrough
CT: control target
= control target key end

     0   :  { %s362_s0 = inlined_call_operand.vmem [shape: f32[2,128], index: 0, kind: input, shape index: {}]   ;;  %s363_s1 = inlined_call_operand.vmem [shape: f32[20,2], index: 1, kind: input, shape index: {}]   ;;  %s364_s2 = inlined_call_operand.vmem [shape: f32[20,1], index: 2, kind: input, shape index: {}]   ;;  %s365_s3 = inlined_call_operand.vmem [shape: f32[20,20], index: 3, kind: input, shape index: {}]   ;;  %s366_s4 = inlined_call_operand.vmem [shape: f32[20,1], index: 4, kind: input, shape index: {}]   ;;  %s367_s5 = inlined_call_operand.vmem [shape: f32[20,1], index: 5, kind: input, shape index: {}]   ;;  %s368_s6 = inlined_call_operand.<no memory space> [shape: f32[1,1], index: 6, kind: input, shape index: {}]   ;;  %s369_s7 = inlined_call_operand.hbm [shape: f32[1,128], index: 7, kind: output, shape index: {}]  }
   0x1   :  { %v12_v0 = vstv %s368_s6 }
   0x2   :  { %13 = vst [vmem:[#allocation2] sm:$0x1] %v12_v0 }
   0x3   :  { %v31_v1 = vld [vmem:[%s363_s1 + $0x10] sm:$0xf]  ;;  %v30_v2 = vld [vmem:[%s363_s1 + $0x8] sm:$0xff]  ;;  %v261_v3 = vmov 1   ;;  %v262_v4 = vmov 0   ;;  %v29_v5 = vld [vmem:[%s363_s1] sm:$0xff] }
   0x4   :  { %227 = vset.pattern.permute.xlu0 %v261_v3  ;;  %229 = vset.pattern.permute.xlu1 %v262_v4 }
   0x5   :  { %74 = vperm.xlu0 %227, %v31_v1   ;;  %53 = vperm.xlu1 %229, %v30_v2  }
   0x6   :  { %231 = vset.pattern.permute.xlu2 %v262_v4 }
   0x7   :  { %14 = vsyncpa [#allocation4], 0  ;;  %48 = vperm.xlu2 %231, %v29_v5   ;;  %v32_v6 = vld [vmem:[%s364_s2] sm:$0xff]  ;;  %v34_v7 = vld [vmem:[%s364_s2 + $0x10] sm:$0xf]  ;;  %vm130_vm0 = vcmask 1043456  }
   0x8   :  { %v33_v8 = vld [vmem:[%s364_s2 + $0x8] sm:$0xff]  ;;  %v38_v10 = vld [vmem:[%s366_s4] sm:$0xff]  ;;  %v40_v12 = vld [vmem:[%s366_s4 + $0x10] sm:$0xf]  ;;  %vm120_vm1 = vcmask 162816   ;;  %s205_s6 = sshll.u32 %s369_s7, 4  ;;  %s206_s6 = int_to_ptr.hbm [resolvable:$true] %s205_s6 }
   0x9   :  { %v42_v9 = vld [vmem:[%s367_s5 + $0x8] sm:$0xff]  ;;  %v41_v13 = vld [vmem:[%s367_s5] sm:$0xff]  ;;  %v43_v14 = vld [vmem:[%s367_s5 + $0x10] sm:$0xf] }
   0xa   :  { %v39_v11 = vld [vmem:[%s366_s4 + $0x8] sm:$0xff]  ;;  %v44_v15 = vld [vmem:[#allocation2] sm:$0x1]  ;;  %v37_v45 = vld [vmem:[%s365_s3 + $0x10] sm:$0xf] }
   0xb   :  { %v45_v19 = vld [vmem:[%s362_s0] sm:$0x3]  ;;  %v36_v44 = vld [vmem:[%s365_s3 + $0x8] sm:$0xff] }
   0xc   :  { %v61_v21 = vperm.slane %v45_v19, 0  ;;  %v77_v22 = vperm.slane %v45_v19, 1  ;;  %v35_v43 = vld [vmem:[%s365_s3] sm:$0xff]  ;;  %s263_s3 = smov [#allocation3]  }
   0xd   :  { %228 = vset.pattern.permute.xlu0 %v262_v4  ;;  %230 = vset.pattern.permute.xlu1 %v261_v3  ;;  %s203_s29 = sshll.u32 %s263_s3, 4  ;;  %s204_s29 = int_to_ptr.vmem [resolvable:$true] %s203_s29 }
   0xe   :  { %58 = vperm.xlu0 %228, %v31_v1   ;;  %70 = vperm.xlu1 %230, %v30_v2  }
   0xf   :  { %232 = vset.pattern.permute.xlu2 %v261_v3 }
  0x10   :  { %66 = vperm.xlu2 %232, %v29_v5  }
  0x16   :  { %86 = vperm.xlu0 %228, %v32_v6   ;;  %233 = vset.pattern.permute.xlu1 %v262_v4 }
  0x17   :  { %96 = vperm.xlu1 %233, %v34_v7  }
  0x18   :  { %234 = vset.pattern.permute.xlu2 %v262_v4 }
  0x19   :  { %91 = vperm.xlu2 %234, %v33_v8  }
  0x1e   :  { %170 = vperm.xlu0 %228, %v42_v9  }
  0x1f   :  { %107 = vperm.xlu1 %233, %v38_v10  }
  0x21   :  { %112 = vperm.xlu2 %234, %v39_v11  }
  0x27   :  { %117 = vperm.xlu1 %233, %v40_v12  }
  0x29   :  { %165 = vperm.xlu2 %234, %v41_v13  }
  0x2f   :  { %175 = vperm.xlu1 %233, %v43_v14  }
  0x31   :  { %192 = vperm.xlu2 %234, %v44_v15  }
  0x61   :  { %v49_v16 = vpop.permute.xlu2 %48 }
  0x62   :  { %v62_v28 = vmul.f32 %v61_v21, %v49_v16 }
  0x6a   :  { %v67_v20 = vpop.permute.xlu2 %66 }
  0x6b   :  { %v78_v29 = vmul.f32 %v77_v22, %v67_v20 }
  0x6d   :  { %v81_v36 = vadd.f32 %v78_v29, %v62_v28 }
  0x73   :  { %v92_v32 = vpop.permute.xlu2 %91 }
  0x77   :  { %v54_v17 = vpop.permute.xlu1 %53  ;;  %v75_v18 = vpop.permute.xlu0 %74 }
  0x78   :  { %v63_v26 = vmul.f32 %v61_v21, %v54_v17  ;;  %v80_v30 = vmul.f32 %v77_v22, %v75_v18 }
  0x7b   :  { %v113_v47 = vpop.permute.xlu2 %112 }
  0x80   :  { %v59_v23 = vpop.permute.xlu0 %58  ;;  %v71_v24 = vpop.permute.xlu1 %70 }
  0x81   :  { %v79_v25 = vmul.f32 %v77_v22, %v71_v24  ;;  %v64_v27 = vmul.f32 %v61_v21, %v59_v23 }
  0x83   :  { %v82_v31 = vadd.f32 %v79_v25, %v63_v26  ;;  %v83_v33 = vadd.f32 %v80_v30, %v64_v27  ;;  %v166_v56 = vpop.permute.xlu2 %165 }
  0x85   :  { %v100_v38 = vadd.f32 %v92_v32, %v82_v31 }
  0x87   :  { %v103_v41 = vmax.f32 %v100_v38, 0.0 }
  0x88   :  { %v87_v34 = vpop.permute.xlu0 %86 }
  0x89   :  { %v97_v35 = vpop.permute.xlu1 %96  ;;  %v99_v39 = vadd.f32 %v87_v34, %v81_v36 }
  0x8a   :  { %v101_v37 = vadd.f32 %v97_v35, %v83_v33 }
  0x8b   :  { %v102_v42 = vmax.f32 %v99_v39, 0.0  ;;  %v193_v7 = vpop.permute.xlu2 %192 }
  0x8c   :  { %v104_v40 = vmax.f32 %v101_v37, 0.0  ;;  %v195_v9 = vperm.slane %v193_v7, 0 }
  0x8e   :  { %214 = vmatpush.msk.msra.mxu0 %vm130_vm0, %v104_v40  ;;  %218 = vmatpush.msk.msra.mxu1 %vm130_vm0, %v104_v40 }
  0x8f   :  { %219 = vmatpush.msk.msra.mxu2 %vm130_vm0, %v104_v40 }
  0x90   :  { %148 = vmatpush.msra.mxu0 %v103_v41  ;;  %220 = vmatpush.msra.mxu1 %v103_v41  ;;  %v171_v57 = vpop.permute.xlu0 %170 }
  0x91   :  { %221 = vmatpush.msra.mxu2 %v103_v41  ;;  %v108_v46 = vpop.permute.xlu1 %107 }
  0x92   :  { %149 = vmatpush.msra.mxu0 %v102_v42  ;;  %222 = vmatpush.msra.mxu1 %v102_v42 }
  0x93   :  { %223 = vmatpush.msra.mxu2 %v102_v42  ;;  %215 = vmatmul.msk.f32.vlgmr.msra.gmra.mxu0 %vm120_vm1, %v35_v43 }
  0x94   :  { %216 = vmatmul.msk.f32.vlgmr.msra.gmra.mxu1 %vm120_vm1, %v36_v44  ;;  %217 = vmatmul.msk.f32.vlgmr.msra.gmra.mxu2 %vm120_vm1, %v37_v45 }
  0x99   :  { %v118_v49 = vpop.permute.xlu1 %117 }
  0xa1   :  { %v176_v62 = vpop.permute.xlu1 %175 }
 0x110   :  { %v151_v48 = vpop.f32.mrf.mxu0 }
 0x111   :  { %v152_v50 = vadd.f32 %v151_v48, %v108_v46  ;;  %v154_v51 = vpop.f32.mrf.mxu1 }
 0x112   :  { %v155_v52 = vadd.f32 %v154_v51, %v113_v47 }
 0x113   :  { %v160_v53 = vmax.f32 %v152_v50, 0.0 }
 0x114   :  { %v161_v54 = vmax.f32 %v155_v52, 0.0 }
 0x115   :  { %v178_v59 = vmul.f32 %v166_v56, %v160_v53 }
 0x116   :  { %v179_v60 = vmul.f32 %v171_v57, %v161_v54 }
 0x117   :  { %v157_v55 = vpop.f32.mrf.mxu2 }
 0x118   :  { %v158_v58 = vadd.f32 %v157_v55, %v118_v49  ;;  %v181_v0 = vadd.f32 %v179_v60, %v178_v59 }
 0x11a   :  { %v162_v61 = vmax.f32 %v158_v58, 0.0 }
 0x11c   :  { %v180_v63 = vmul.f32 %v176_v62, %v162_v61 }
 0x11e   :  { %v182_v1 = vsel %vm130_vm0, %v180_v63, 0.0 }
 0x11f   :  { %v183_v2 = vadd.f32 %v182_v1, %v181_v0 }
 0x121   :  { %v184_v3 = vrot.slane %v183_v2, 4 }
 0x123   :  { %v185_v4 = vadd.f32 %v184_v3, %v183_v2 }
 0x125   :  { %v186_v5 = vrot.slane %v185_v4, 2 }
 0x127   :  { %v187_v6 = vadd.f32 %v186_v5, %v185_v4 }
 0x129   :  { %v188_v8 = vrot.slane %v187_v6, 1 }
 0x12b   :  { %v189_v10 = vadd.f32 %v188_v8, %v187_v6 }
 0x12d   :  { %v196_v11 = vadd.f32 %v195_v9, %v189_v10 }
 0x12f   :  { %197 = vst [vmem:[#allocation3] sm:$0x1] %v196_v11 }
 0x130   :  { %208 = dma.vmem_to_hbm [thread:$0]  %s204_s29, 16, %s206_s6, [#allocation4]  }
 0x131   :  { %259 = dma.done.wait [#allocation4], 16  }
 0x132   :  { %260 = vsyncadd [#allocation4], 4294967280 }
 0x133   :  { %213 = vsyncpa [#allocation4], 1 }

</bundles_post_ra>
